<compile_context>
chip_gen: v7x
topology: tpu7x:2x2x1
jax: 0.10.0
libtpu: 0.0.40
codegen_flags: <defaults>
</compile_context>

<pallas_src>
import functools

import jax
import jax.numpy as jnp
from jax import lax
from jax.experimental import pallas as pl
from jax.experimental.pallas import tpu as pltpu

LN_EPS = 1e-5
H1 = 128   # fc1 output / LayerNorm(128)
H2 = 64    # fc2 / action_value output / LayerNorm(64)


def _round_up(n, m):
    return ((n + m - 1) // m) * m


# ----------------------------------------------------------------------------
# Kernel
# ----------------------------------------------------------------------------
def critic_kernel(x_ref, a_ref, w_ref, p_ref, o_ref, *, w2_off):
    """One batch tile: x [TB,S], a [TB,A] -> o [1,TB]."""
    f32 = jnp.float32
    S = x_ref.shape[-1]
    A = a_ref.shape[-1]

    x = x_ref[...]                                      # [TB, S]
    a = a_ref[...]                                      # [TB, A]

    # Static, start-aligned views into the packed weight slab.
    # NOTE: correctness of the masked LN(64), action branch and q head relies on
    # lanes >= 64 of w2/wa (and of b2/g2/be2/ba/wq in p_ref) being exactly zero,
    # which pack_params guarantees.
    w1 = w_ref[0:S, :]                                  # [S, 128]
    w2 = w_ref[w2_off:w2_off + H1, :]                   # [128, 128] (cols >= 64 zero)
    wa = w_ref[w2_off + H1:w2_off + H1 + A, :]          # [A, 128]   (cols >= 64 zero)

    b1, g1, be1 = p_ref[0:1, :], p_ref[1:2, :], p_ref[2:3, :]   # [1,128]
    b2, g2, be2 = p_ref[3:4, :], p_ref[4:5, :], p_ref[5:6, :]   # [1,128], cols>=64 zero
    ba = p_ref[6:7, :]                                  # [1,128], cols >= 64 zero
    wq = p_ref[7:8, :]                                  # [1,128], cols >= 64 zero
    bq = p_ref[8:9, 0:1]                                # [1,1]

    # --- state branch: fc1 -> LayerNorm(128) -> relu ---
    h = jnp.dot(x, w1, preferred_element_type=f32) + b1          # [TB,128]
    mu = jnp.mean(h, axis=-1, keepdims=True)                     # two independent
    ex2 = jnp.mean(h * h, axis=-1, keepdims=True)                # XLU reductions
    var = jnp.maximum(ex2 - mu * mu, 0.0)
    h = (h - mu) * lax.rsqrt(var + LN_EPS) * g1 + be1
    h = jnp.maximum(h, 0.0)

    # --- fc2 -> LayerNorm(64): lanes >= 64 of z are exactly 0, so full-lane sums
    # equal sums over the first 64 lanes; g2/be2 zeros keep sv zero there. ---
    z = jnp.dot(h, w2, preferred_element_type=f32) + b2          # [TB,128]
    inv_n = 1.0 / H2
    mu2 = jnp.sum(z, axis=-1, keepdims=True) * inv_n
    ez2 = jnp.sum(z * z, axis=-1, keepdims=True) * inv_n
    var2 = jnp.maximum(ez2 - mu2 * mu2, 0.0)
    sv = (z - mu2) * lax.rsqrt(var2 + LN_EPS) * g2 + be2         # cols>=64 stay 0

    # --- action branch: Linear -> relu ---
    av = jnp.maximum(jnp.dot(a, wa, preferred_element_type=f32) + ba, 0.0)

    # --- merge + q head (lane-dense [1, TB] output) ---
    sa = jnp.maximum(sv + av, 0.0)                               # [TB,128], cols>=64 zero
    # q[0, t] = sum_f wq[0, f] * sa[t, f]   (contract both on their last dim)
    q = lax.dot_general(wq, sa, (((1,), (1,)), ((), ())),
                        preferred_element_type=f32)              # [1, TB]
    o_ref[...] = (q + bq).astype(o_ref.dtype)


# ----------------------------------------------------------------------------
# Parameter packing (done once per parameter set, outside the kernel)
# ----------------------------------------------------------------------------
def pack_params(params, state_dim, action_dim):
    s_pad = _round_up(state_dim, 8)
    a_pad = _round_up(action_dim, 8)

    # Lanes / rows not explicitly set below MUST stay zero (kernel relies on it).
    w = jnp.zeros((s_pad + H1 + a_pad, H1), jnp.float32)
    w = w.at[0:state_dim, :].set(params["w1"])                            # [S,128]
    w = w.at[s_pad:s_pad + H1, 0:H2].set(params["w2"])                    # [128,64]
    w = w.at[s_pad + H1:s_pad + H1 + action_dim, 0:H2].set(params["wa"])  # [A,64]

    p = jnp.zeros((16, H1), jnp.float32)
    p = p.at[0, :].set(params["b1"].reshape(-1))
    p = p.at[1, :].set(params["g1"].reshape(-1))
    p = p.at[2, :].set(params["be1"].reshape(-1))
    p = p.at[3, 0:H2].set(params["b2"].reshape(-1))
    p = p.at[4, 0:H2].set(params["g2"].reshape(-1))
    p = p.at[5, 0:H2].set(params["be2"].reshape(-1))
    p = p.at[6, 0:H2].set(params["ba"].reshape(-1))
    p = p.at[7, 0:H2].set(params["wq"].reshape(-1))
    p = p.at[8, 0].set(params["bq"].reshape(-1)[0])
    return w, p


# ----------------------------------------------------------------------------
# Wrapper
# ----------------------------------------------------------------------------
def critic_forward(state, action, w_slab, p_slab, *,
                   max_batch_tile=2048, min_split_batch=256):
    state = state.astype(jnp.float32)     # no-op for f32 inputs
    action = action.astype(jnp.float32)
    B, S = state.shape
    Ba, A = action.shape
    assert Ba == B
    s_pad = _round_up(S, 8)
    a_pad = _round_up(A, 8)
    assert w_slab.shape == (s_pad + H1 + a_pad, H1)
    assert p_slab.shape == (16, H1)

    # Tile selection: single tile for small batches (block == full dims, no
    # alignment constraints); otherwise >= 2 tiles (even count when possible)
    # with tb a multiple of 128 so the lane-dense output block stays aligned and
    # v7x can shard the batch axis across both TensorCores.
    if B < min_split_batch:
        tb = B
        grid_n = 1
    else:
        steps = max(2, pl.cdiv(B, max_batch_tile))
        steps += steps % 2                         # prefer an even step count
        tb = _round_up(pl.cdiv(B, steps), 128)
        grid_n = pl.cdiv(B, tb)                    # ragged last tile is fine

    # VMEM budget from the actual footprint (double-buffered IO tiles + resident
    # slabs + ~10 live [tb,128] f32 intermediates), floored at the 32 MiB scoped
    # default and capped below v7x's 64 MiB physical VMEM.
    interm = 10 * tb * H1 * 4
    io = 2 * tb * (S + A + 1) * 4
    slabs = 2 * 4 * (int(w_slab.size) + int(p_slab.size))
    vmem_limit = int(min(max(2 * (interm + io + slabs), 32 * 1024 * 1024),
                         64 * 1024 * 1024))

    kernel = functools.partial(critic_kernel, w2_off=s_pad)

    out = pl.pallas_call(
        kernel,
        out_shape=jax.ShapeDtypeStruct((1, B), jnp.float32),
        grid_spec=pltpu.PrefetchScalarGridSpec(
            num_scalar_prefetch=0,
            grid=(grid_n,),
            in_specs=[
                pl.BlockSpec((tb, S), lambda i: (i, 0)),       # state tile (unpadded)
                pl.BlockSpec((tb, A), lambda i: (i, 0)),       # action tile (unpadded)
                pl.BlockSpec(w_slab.shape, lambda i: (0, 0)),  # resident weights
                pl.BlockSpec(p_slab.shape, lambda i: (0, 0)),  # resident bias/LN/wq
            ],
            out_specs=pl.BlockSpec((1, tb), lambda i: (0, i)), # lane-dense q row
        ),
        compiler_params=pltpu.CompilerParams(
            dimension_semantics=("parallel",),
            vmem_limit_bytes=vmem_limit,
        ),
    )(state, action, w_slab, p_slab)

    return out.reshape(B, 1)


# ----------------------------------------------------------------------------
# Init (mirrors Critic.initialization()) and pure-JAX reference
# ----------------------------------------------------------------------------
def init_params(key, state_dim, action_dim):
    ks = jax.random.split(key, 8)
    f1 = 1.0 / jnp.sqrt(jnp.float32(H1))    # 1/sqrt(fc1.weight.size(0)) = 1/sqrt(128)
    f2 = 1.0 / jnp.sqrt(jnp.float32(H2))    # 1/sqrt(64)
    f3 = 0.003
    fa = 1.0 / jnp.sqrt(jnp.float32(action_dim))
    # TODO(synk): fa uses PyTorch-default-like bound for action_value (reference
    # does not re-init that layer explicitly); kernel numerics are unaffected.

    def unif(k, shape, bound):
        return jax.random.uniform(k, shape, jnp.float32, -bound, bound)

    return {
        "w1": unif(ks[0], (state_dim, H1), f1), "b1": unif(ks[1], (1, H1), f1),
        "g1": jnp.ones((1, H1), jnp.float32), "be1": jnp.zeros((1, H1), jnp.float32),
        "w2": unif(ks[2], (H1, H2), f2), "b2": unif(ks[3], (1, H2), f2),
        "g2": jnp.ones((1, H2), jnp.float32), "be2": jnp.zeros((1, H2), jnp.float32),
        "wa": unif(ks[4], (action_dim, H2), fa), "ba": unif(ks[5], (1, H2), fa),
        "wq": unif(ks[6], (H2, 1), f3), "bq": unif(ks[7], (1, 1), f3),
    }


def critic_reference(state, action, params):
    def ln(x, g, b):
        mu = jnp.mean(x, axis=-1, keepdims=True)
        var = jnp.mean((x - mu) ** 2, axis=-1, keepdims=True)
        return (x - mu) * lax.rsqrt(var + LN_EPS) * g + b

    h = jnp.maximum(ln(state @ params["w1"] + params["b1"],
                       params["g1"], params["be1"]), 0.0)
    sv = ln(h @ params["w2"] + params["b2"], params["g2"], params["be2"])
    av = jnp.maximum(action @ params["wa"] + params["ba"], 0.0)
    sa = jnp.maximum(sv + av, 0.0)
    return sa @ params["wq"] + params["bq"]


if __name__ == "__main__":
    key = jax.random.PRNGKey(0)
    k_state, k_action, k_params = jax.random.split(key, 3)

    batch, state_dim, action_dim = 8, 12, 4
    state = jax.random.normal(k_state, (batch, state_dim), jnp.float32)
    action = jax.random.normal(k_action, (batch, action_dim), jnp.float32)
    params = init_params(k_params, state_dim, action_dim)
    w_slab, p_slab = pack_params(params, state_dim, action_dim)

    # Small batch (single tile, block == full dims).
    q = critic_forward(state, action, w_slab, p_slab)
    jax.block_until_ready(q)
    assert q.shape == (batch, 1) and q.dtype == jnp.float32
    q_ref = critic_reference(state, action, params)
    assert float(jnp.max(jnp.abs(q - q_ref))) < 5e-3

    # Larger, non-aligned batch: exercises the multi-tile grid (2 steps, tb=640)
    # and the ragged last tile (no wrapper-side padding of any kind).
    big_b = 1040
    kb1, kb2 = jax.random.split(jax.random.PRNGKey(1))
    big_state = jax.random.normal(kb1, (big_b, state_dim), jnp.float32)
    big_action = jax.random.normal(kb2, (big_b, action_dim), jnp.float32)
    q_big = critic_forward(big_state, big_action, w_slab, p_slab)
    jax.block_until_ready(q_big)
    assert q_big.shape == (big_b, 1)
    q_big_ref = critic_reference(big_state, big_action, params)
    assert float(jnp.max(jnp.abs(q_big - q_big_ref))) < 5e-3

    print("KERNEL_OK")
</pallas_src>

<mosaic_0001>
module attributes {stable_mosaic.version = 11 : i64} {
  func.func @critic_kernel(%arg0: i32, %arg1: memref<8x12xf32, #tpu.memory_space<vmem>>, %arg2: memref<8x4xf32, #tpu.memory_space<vmem>>, %arg3: memref<152x128xf32, #tpu.memory_space<vmem>>, %arg4: memref<16x128xf32, #tpu.memory_space<vmem>>, %arg5: memref<1x8xf32, #tpu.memory_space<vmem>>) attributes {dimension_semantics = [#tpu.dimension_semantics<parallel>], iteration_bounds = array<i64: 1>, scalar_prefetch = 0 : i64, scratch_operands = 0 : i64, tpu.core_type = #tpu.core_type<tc>, window_params = [{transform_indices = @transform_0, window_bounds = array<i64: 8, 12>}, {transform_indices = @transform_1, window_bounds = array<i64: 8, 4>}, {pipeline_mode = #tpu.pipeline_mode<synchronous>, transform_indices = @transform_2, window_bounds = array<i64: 152, 128>}, {pipeline_mode = #tpu.pipeline_mode<synchronous>, transform_indices = @transform_3, window_bounds = array<i64: 16, 128>}, {transform_indices = @transform_4, window_bounds = array<i64: 1, 8>}]} {
    %c0 = arith.constant 0 : index
    %c0_0 = arith.constant 0 : index
    %0 = vector.load %arg1[%c0, %c0_0] : memref<8x12xf32, #tpu.memory_space<vmem>>, vector<8x12xf32>
    %c0_1 = arith.constant 0 : index
    %c0_2 = arith.constant 0 : index
    %1 = vector.load %arg2[%c0_1, %c0_2] : memref<8x4xf32, #tpu.memory_space<vmem>>, vector<8x4xf32>
    %c0_3 = arith.constant 0 : index
    %c0_4 = arith.constant 0 : index
    %2 = vector.load %arg3[%c0_3, %c0_4] : memref<152x128xf32, #tpu.memory_space<vmem>>, vector<12x128xf32>
    %c16 = arith.constant 16 : index
    %c0_5 = arith.constant 0 : index
    %3 = vector.load %arg3[%c16, %c0_5] : memref<152x128xf32, #tpu.memory_space<vmem>>, vector<128x128xf32>
    %c144 = arith.constant 144 : index
    %c0_6 = arith.constant 0 : index
    %4 = vector.load %arg3[%c144, %c0_6] : memref<152x128xf32, #tpu.memory_space<vmem>>, vector<4x128xf32>
    %c0_7 = arith.constant 0 : index
    %c0_8 = arith.constant 0 : index
    %5 = vector.load %arg4[%c0_7, %c0_8] : memref<16x128xf32, #tpu.memory_space<vmem>>, vector<1x128xf32>
    %c1 = arith.constant 1 : index
    %c0_9 = arith.constant 0 : index
    %6 = vector.load %arg4[%c1, %c0_9] : memref<16x128xf32, #tpu.memory_space<vmem>>, vector<1x128xf32>
    %c2 = arith.constant 2 : index
    %c0_10 = arith.constant 0 : index
    %7 = vector.load %arg4[%c2, %c0_10] : memref<16x128xf32, #tpu.memory_space<vmem>>, vector<1x128xf32>
    %c3 = arith.constant 3 : index
    %c0_11 = arith.constant 0 : index
    %8 = vector.load %arg4[%c3, %c0_11] : memref<16x128xf32, #tpu.memory_space<vmem>>, vector<1x128xf32>
    %c4 = arith.constant 4 : index
    %c0_12 = arith.constant 0 : index
    %9 = vector.load %arg4[%c4, %c0_12] : memref<16x128xf32, #tpu.memory_space<vmem>>, vector<1x128xf32>
    %c5 = arith.constant 5 : index
    %c0_13 = arith.constant 0 : index
    %10 = vector.load %arg4[%c5, %c0_13] : memref<16x128xf32, #tpu.memory_space<vmem>>, vector<1x128xf32>
    %c6 = arith.constant 6 : index
    %c0_14 = arith.constant 0 : index
    %11 = vector.load %arg4[%c6, %c0_14] : memref<16x128xf32, #tpu.memory_space<vmem>>, vector<1x128xf32>
    %c7 = arith.constant 7 : index
    %c0_15 = arith.constant 0 : index
    %12 = vector.load %arg4[%c7, %c0_15] : memref<16x128xf32, #tpu.memory_space<vmem>>, vector<1x128xf32>
    %c8 = arith.constant 8 : index
    %c0_16 = arith.constant 0 : index
    %13 = vector.load %arg4[%c8, %c0_16] : memref<16x128xf32, #tpu.memory_space<vmem>>, vector<1x1xf32>
    %cst = arith.constant dense<0.000000e+00> : vector<8x128xf32>
    %14 = tpu.matmul %0, %2, %cst {dimension_numbers = #tpu.dot_dimension_numbers<[1], [0], [0], [1], [0, 0, 1, 1], [], []>} : vector<8x12xf32>, vector<12x128xf32>, vector<8x128xf32> -> vector<8x128xf32>
    %15 = vector.broadcast %5 : vector<1x128xf32> to vector<8x128xf32>
    %16 = arith.addf %14, %15 : vector<8x128xf32>
    %cst_17 = arith.constant dense<0.000000e+00> : vector<8xf32>
    %17 = vector.multi_reduction <add>, %16, %cst_17 [1] : vector<8x128xf32> to vector<8xf32>
    %18 = vector.shape_cast %17 : vector<8xf32> to vector<8x1xf32>
    %cst_18 = arith.constant 1.280000e+02 : f32
    %19 = vector.broadcast %cst_18 : f32 to vector<8x1xf32>
    %20 = arith.divf %18, %19 : vector<8x1xf32>
    %21 = arith.mulf %16, %16 : vector<8x128xf32>
    %cst_19 = arith.constant dense<0.000000e+00> : vector<8xf32>
    %22 = vector.multi_reduction <add>, %21, %cst_19 [1] : vector<8x128xf32> to vector<8xf32>
    %23 = vector.shape_cast %22 : vector<8xf32> to vector<8x1xf32>
    %cst_20 = arith.constant 1.280000e+02 : f32
    %24 = vector.broadcast %cst_20 : f32 to vector<8x1xf32>
    %25 = arith.divf %23, %24 : vector<8x1xf32>
    %26 = arith.mulf %20, %20 : vector<8x1xf32>
    %27 = arith.subf %25, %26 : vector<8x1xf32>
    %cst_21 = arith.constant 0.000000e+00 : f32
    %28 = vector.broadcast %cst_21 : f32 to vector<8x1xf32>
    %29 = arith.maximumf %27, %28 : vector<8x1xf32>
    %30 = vector.broadcast %20 : vector<8x1xf32> to vector<8x128xf32>
    %31 = arith.subf %16, %30 : vector<8x128xf32>
    %cst_22 = arith.constant 9.99999974E-6 : f32
    %32 = vector.broadcast %cst_22 : f32 to vector<8x1xf32>
    %33 = arith.addf %29, %32 : vector<8x1xf32>
    %34 = math.rsqrt %33 : vector<8x1xf32>
    %35 = vector.broadcast %34 : vector<8x1xf32> to vector<8x128xf32>
    %36 = arith.mulf %31, %35 : vector<8x128xf32>
    %37 = vector.broadcast %6 : vector<1x128xf32> to vector<8x128xf32>
    %38 = arith.mulf %36, %37 : vector<8x128xf32>
    %39 = vector.broadcast %7 : vector<1x128xf32> to vector<8x128xf32>
    %40 = arith.addf %38, %39 : vector<8x128xf32>
    %cst_23 = arith.constant 0.000000e+00 : f32
    %41 = vector.broadcast %cst_23 : f32 to vector<8x128xf32>
    %42 = arith.maximumf %40, %41 : vector<8x128xf32>
    %cst_24 = arith.constant dense<0.000000e+00> : vector<8x128xf32>
    %43 = tpu.matmul %42, %3, %cst_24 {dimension_numbers = #tpu.dot_dimension_numbers<[1], [0], [0], [1], [0, 0, 1, 1], [], []>} : vector<8x128xf32>, vector<128x128xf32>, vector<8x128xf32> -> vector<8x128xf32>
    %44 = vector.broadcast %8 : vector<1x128xf32> to vector<8x128xf32>
    %45 = arith.addf %43, %44 : vector<8x128xf32>
    %cst_25 = arith.constant dense<0.000000e+00> : vector<8xf32>
    %46 = vector.multi_reduction <add>, %45, %cst_25 [1] : vector<8x128xf32> to vector<8xf32>
    %47 = vector.shape_cast %46 : vector<8xf32> to vector<8x1xf32>
    %cst_26 = arith.constant 1.562500e-02 : f32
    %48 = vector.broadcast %cst_26 : f32 to vector<8x1xf32>
    %49 = arith.mulf %47, %48 : vector<8x1xf32>
    %50 = arith.mulf %45, %45 : vector<8x128xf32>
    %cst_27 = arith.constant dense<0.000000e+00> : vector<8xf32>
    %51 = vector.multi_reduction <add>, %50, %cst_27 [1] : vector<8x128xf32> to vector<8xf32>
    %52 = vector.shape_cast %51 : vector<8xf32> to vector<8x1xf32>
    %cst_28 = arith.constant 1.562500e-02 : f32
    %53 = vector.broadcast %cst_28 : f32 to vector<8x1xf32>
    %54 = arith.mulf %52, %53 : vector<8x1xf32>
    %55 = arith.mulf %49, %49 : vector<8x1xf32>
    %56 = arith.subf %54, %55 : vector<8x1xf32>
    %cst_29 = arith.constant 0.000000e+00 : f32
    %57 = vector.broadcast %cst_29 : f32 to vector<8x1xf32>
    %58 = arith.maximumf %56, %57 : vector<8x1xf32>
    %59 = vector.broadcast %49 : vector<8x1xf32> to vector<8x128xf32>
    %60 = arith.subf %45, %59 : vector<8x128xf32>
    %cst_30 = arith.constant 9.99999974E-6 : f32
    %61 = vector.broadcast %cst_30 : f32 to vector<8x1xf32>
    %62 = arith.addf %58, %61 : vector<8x1xf32>
    %63 = math.rsqrt %62 : vector<8x1xf32>
    %64 = vector.broadcast %63 : vector<8x1xf32> to vector<8x128xf32>
    %65 = arith.mulf %60, %64 : vector<8x128xf32>
    %66 = vector.broadcast %9 : vector<1x128xf32> to vector<8x128xf32>
    %67 = arith.mulf %65, %66 : vector<8x128xf32>
    %68 = vector.broadcast %10 : vector<1x128xf32> to vector<8x128xf32>
    %69 = arith.addf %67, %68 : vector<8x128xf32>
    %cst_31 = arith.constant dense<0.000000e+00> : vector<8x128xf32>
    %70 = tpu.matmul %1, %4, %cst_31 {dimension_numbers = #tpu.dot_dimension_numbers<[1], [0], [0], [1], [0, 0, 1, 1], [], []>} : vector<8x4xf32>, vector<4x128xf32>, vector<8x128xf32> -> vector<8x128xf32>
    %71 = vector.broadcast %11 : vector<1x128xf32> to vector<8x128xf32>
    %72 = arith.addf %70, %71 : vector<8x128xf32>
    %cst_32 = arith.constant 0.000000e+00 : f32
    %73 = vector.broadcast %cst_32 : f32 to vector<8x128xf32>
    %74 = arith.maximumf %72, %73 : vector<8x128xf32>
    %75 = arith.addf %69, %74 : vector<8x128xf32>
    %cst_33 = arith.constant 0.000000e+00 : f32
    %76 = vector.broadcast %cst_33 : f32 to vector<8x128xf32>
    %77 = arith.maximumf %75, %76 : vector<8x128xf32>
    %cst_34 = arith.constant dense<0.000000e+00> : vector<1x8xf32>
    %78 = tpu.matmul %12, %77, %cst_34 {dimension_numbers = #tpu.dot_dimension_numbers<[1], [1], [0], [0], [0, 0, 1, 0], [], []>} : vector<1x128xf32>, vector<8x128xf32>, vector<1x8xf32> -> vector<1x8xf32>
    %79 = vector.broadcast %13 : vector<1x1xf32> to vector<1x8xf32>
    %80 = arith.addf %78, %79 : vector<1x8xf32>
    %c0_35 = arith.constant 0 : index
    %c0_36 = arith.constant 0 : index
    %81 = vector.load %arg5[%c0_35, %c0_36] : memref<1x8xf32, #tpu.memory_space<vmem>>, vector<1x8xf32>
    tpu.vector_store %arg5[%c0_35, %c0_36], %80 {strides = array<i32>} : memref<1x8xf32, #tpu.memory_space<vmem>>, vector<1x8xf32>,
    return
  }
  func.func @transform_0(%arg0: i32) -> (i32, i32) {
    %c0_i32 = arith.constant 0 : i32
    %c0_i32_0 = arith.constant 0 : i32
    return %arg0, %c0_i32 : i32, i32
  }
  func.func @transform_1(%arg0: i32) -> (i32, i32) {
    %c0_i32 = arith.constant 0 : i32
    %c0_i32_0 = arith.constant 0 : i32
    return %arg0, %c0_i32 : i32, i32
  }
  func.func @transform_2(%arg0: i32) -> (i32, i32) {
    %c0_i32 = arith.constant 0 : i32
    %c0_i32_0 = arith.constant 0 : i32
    %c0_i32_1 = arith.constant 0 : i32
    return %c0_i32, %c0_i32_0 : i32, i32
  }
  func.func @transform_3(%arg0: i32) -> (i32, i32) {
    %c0_i32 = arith.constant 0 : i32
    %c0_i32_0 = arith.constant 0 : i32
    %c0_i32_1 = arith.constant 0 : i32
    return %c0_i32, %c0_i32_0 : i32, i32
  }
  func.func @transform_4(%arg0: i32) -> (i32, i32) {
    %c0_i32 = arith.constant 0 : i32
    %c0_i32_0 = arith.constant 0 : i32
    return %c0_i32, %arg0 : i32, i32
  }
}

</mosaic_0001>

<bundles_post_ra>
// kernel: tpu_custom_call.1
= control target key start
LH: loop header
LB: loop body
LE: loop exit
PB: predicated region body
PF: predicated region fallthrough
CT: control target
= control target key end

     0   :  { %9 = vsyncpa [#allocation3], 0  ;;  %s794_s0 = inlined_call_operand.hbm [shape: f32[8,12], index: 0, kind: input, shape index: {}]   ;;  %s795_s1 = inlined_call_operand.vmem [shape: f32[8,4], index: 1, kind: input, shape index: {}]   ;;  %s796_s2 = inlined_call_operand.hbm [shape: f32[152,128], index: 2, kind: input, shape index: {}]   ;;  %s797_s3 = inlined_call_operand.vmem [shape: f32[16,128], index: 3, kind: input, shape index: {}]   ;;  %s798_s4 = inlined_call_operand.hbm [shape: f32[1,8], index: 4, kind: output, shape index: {}]  }
   0x1   :  { %10 = vsyncpa [#allocation6], 0 }
   0x2   :  { %11 = vsyncpa [#allocation4], 0  ;;  %s659_s15 = smov [#allocation2]   ;;  %s660_s17 = smov [#allocation5]  }
   0x3   :  { %s18_s16 = sshll.u32 %s659_s15, 4  ;;  %s29_s18 = sshll.u32 %s660_s17, 4  ;;  %s19_s16 = int_to_ptr.vmem [resolvable:$true] %s18_s16  ;;  %s694_s18 = int_to_ptr.vmem [resolvable:$true] %s29_s18 }
   0x4   :  { %s587_s21 = scalar_lea.hbm %s794_s0, 128 }
   0x5   :  { %p588_p0 = scmp.ne.s32.totalorder %s794_s0, %s587_s21  ;;  %p591_p1 = scmp.lt.u32.totalorder %s587_s21, %s794_s0 }
   0x7   :  { %p593_p2 = pnand %p591_p1, %p588_p0 }
   0x9   :  { %596 = shalt.err (!%p593_p2)
}
   0xa   :  { %s597_s26 = scalar_lea.vmem %s19_s16, 128  ;;  %p602_p4 = scmp.lt.s32.totalorder %s19_s16, %s19_s16 }
   0xb   :  { %p598_p3 = scmp.ne.s32.totalorder %s19_s16, %s597_s26  ;;  %p603_p5 = scmp.lt.s32.totalorder %s597_s26, %s597_s26 }
   0xd   :  { %p604_p6 = por %p603_p5, %p602_p4 }
   0xf   :  { %p605_p7 = pnand %p604_p6, %p598_p3 }
  0x11   :  { %608 = shalt.err (!%p605_p7)
}
  0x12   :  { %21 = dma.hbm_to_vmem [thread:$0]  %s794_s0, 128, %s19_s16, [#allocation3]  }
  0x13   :  { %s609_s5 = scalar_lea.hbm %s796_s2, 2432 }
  0x14   :  { %p610_p8 = scmp.ne.s32.totalorder %s796_s2, %s609_s5  ;;  %p613_p9 = scmp.lt.u32.totalorder %s609_s5, %s796_s2 }
  0x16   :  { %p615_p10 = pnand %p613_p9, %p610_p8 }
  0x18   :  { %618 = shalt.err (!%p615_p10)
}
  0x19   :  { %s619_s10 = scalar_lea.vmem %s694_s18, 2432  ;;  %p624_p12 = scmp.lt.s32.totalorder %s694_s18, %s694_s18 }
  0x1a   :  { %p620_p11 = scmp.ne.s32.totalorder %s694_s18, %s619_s10  ;;  %p625_p13 = scmp.lt.s32.totalorder %s619_s10, %s619_s10 }
  0x1c   :  { %p626_p0 = por %p625_p13, %p624_p12 }
  0x1e   :  { %p627_p1 = pnand %p626_p0, %p620_p11 }
  0x20   :  { %630 = shalt.err (!%p627_p1)
}
  0x21   :  { %s661_s0 = smov 128   ;;  %s662_s11 = smov 8  }
  0x22   :  { %35 = dma.hbm_to_vmem [thread:$0]  %s796_s2, 2432, %s694_s18, [#allocation6], %s661_s0, %s661_s0, %s662_s11  }
  0x23   :  { %653 = dma.done.wait [#allocation3], 128  }
  0x24   :  { %654 = vsyncadd [#allocation3], 4294967168 }
  0x25   :  { %655 = dma.done.wait [#allocation6], 2432  }
  0x26   :  { %656 = vsyncadd [#allocation6], 4294964864  ;;  %v663_v0 = vmov 0.0|0.0   ;;  %vm664_vm0 = vmmov 0   ;;  %v665_v1 = vmov 0.0   ;;  %vm82_vm1 = vcmask 1043456  }
  0x27   :  { %544 = vmatprep.subr.bf16.mxu0 %v663_v0  ;;  %548 = vmatprep.subr.bf16.mxu1 %v663_v0  ;;  %v46_v2 = vld [vmem:[#allocation5] sm:$0xff]  ;;  %v47_v3 = vld [vmem:[#allocation5 + $0x8] sm:$0xf]  ;;  %vm666_vm2 = vmmov 1   ;;  %v44_v5 = vld [vmem:[#allocation2] sm:$0xff]  ;;  %vm78_vm4 = vcmask 97280  }
  0x28   :  { %496 = vmatprep.mubr.msk.f32.mxu0 %vm664_vm0, %v665_v1  ;;  %531 = vmatprep.mubr.msk.f32.mxu1 %vm664_vm0, %v665_v1  ;;  %vm546_vm3 = vmpackc.low %vm82_vm1, %vm666_vm2  ;;  %v545_v4 = vpack.c.bf16 %v47_v3, %v46_v2  ;;  %v457_v6 = vld [vmem:[%s797_s3] ss:$0 sm:$0xff]  ;;  %v48_v11 = vld [vmem:[#allocation5 + $0x10] sm:$0xff]  ;;  %vm284_vm5 = vcmask 31744   ;;  %v667_v61 = vmov 0   ;;  %s668_s6 = smov [#allocation7]  }
  0x29   :  { %v49_v12 = vld [vmem:[#allocation5 + $0x18] sm:$0xff]  ;;  %v50_v14 = vld [vmem:[#allocation5 + $0x20] sm:$0xff]  ;;  %v51_v15 = vld [vmem:[#allocation5 + $0x28] sm:$0xff]  ;;  %582 = vset.pattern.permute.xlu0 %v667_v61  ;;  %s447_s7 = sshll.u32 %s668_s6, 4  ;;  %vm439_vm6 = vcmask 57344   ;;  %s448_s7 = int_to_ptr.vmem [resolvable:$true] %s447_s7 }
  0x2a   :  { %547 = vmatpush3.bf16.msk.msra.mxu0 %vm546_vm3, %v545_v4  ;;  %v549_v13 = vpack.c.bf16 %v49_v12, %v48_v11  ;;  %v552_v16 = vpack.c.bf16 %v51_v15, %v50_v14  ;;  %v52_v17 = vld [vmem:[#allocation5 + $0x30] sm:$0xff]  ;;  %v53_v18 = vld [vmem:[#allocation5 + $0x38] sm:$0xff]  ;;  %v54_v20 = vld [vmem:[#allocation5 + $0x40] sm:$0xff]  ;;  %s631_s8 = scalar_lea.vmem %s448_s7, 16  ;;  %s635_s9 = scalar_lea.vmem %s448_s7, 32 }
  0x2b   :  { %534 = vmatprep.subr.mxu0 %v665_v1  ;;  %v555_v19 = vpack.c.bf16 %v53_v18, %v52_v17  ;;  %v55_v21 = vld [vmem:[#allocation5 + $0x48] sm:$0xff]  ;;  %v56_v23 = vld [vmem:[#allocation5 + $0x50] sm:$0xff]  ;;  %v57_v24 = vld [vmem:[#allocation5 + $0x58] sm:$0xff]  ;;  %p632_p2 = scmp.ne.s32.totalorder %s448_s7, %s631_s8  ;;  %p636_p3 = scmp.lt.s32.totalorder %s448_s7, %s448_s7 }
  0x2c   :  { %550 = vmatpush3.bf16.msra.mxu1 %v549_v13  ;;  %v558_v22 = vpack.c.bf16 %v55_v21, %v54_v20  ;;  %v561_v25 = vpack.c.bf16 %v57_v24, %v56_v23  ;;  %v58_v26 = vld [vmem:[#allocation5 + $0x60] sm:$0xff]  ;;  %v59_v27 = vld [vmem:[#allocation5 + $0x68] sm:$0xff]  ;;  %v60_v29 = vld [vmem:[#allocation5 + $0x70] sm:$0xff]  ;;  %p637_p4 = scmp.lt.s32.totalorder %s635_s9, %s631_s8 }
  0x2d   :  { %497 = vmatmul.mubr.msk.f32.vlgmr.msra.gmra.mrb[0].mxu0 %vm78_vm4, %v44_v5  ;;  %551 = vmatprep.subr.bf16.mxu1 %v663_v0  ;;  %v564_v28 = vpack.c.bf16 %v59_v27, %v58_v26  ;;  %v61_v30 = vld [vmem:[#allocation5 + $0x78] sm:$0xff]  ;;  %v62_v32 = vld [vmem:[#allocation5 + $0x80] sm:$0xff]  ;;  %v63_v33 = vld [vmem:[#allocation5 + $0x88] sm:$0xff] }
  0x2e   :  { %536 = vmatprep.mubr.msk.f32.mxu0 %vm664_vm0, %v665_v1  ;;  %v567_v31 = vpack.c.bf16 %v61_v30, %v60_v29  ;;  %v570_v34 = vpack.c.bf16 %v63_v33, %v62_v32  ;;  %v64_v35 = vld [vmem:[#allocation5 + $0x90] sm:$0xf]  ;;  %v45_v36 = vld [vmem:[%s795_s1] sm:$0xff]  ;;  %v73_v60 = vld [vmem:[%s797_s3 + $0x8] sm:$0x1]  ;;  %p638_p5 = por %p637_p4, %p636_p3 }
  0x2f   :  { %535 = vmatpush3.msk.msra.mxu0 %vm82_vm1, %v64_v35  ;;  %v460_v47 = vld [vmem:[%s797_s3 + $0x1] ss:$0 sm:$0xff]  ;;  %v461_v49 = vld [vmem:[%s797_s3 + $0x2] ss:$0 sm:$0xff]  ;;  %v462_v53 = vld [vmem:[%s797_s3 + $0x3] ss:$0 sm:$0xff] }
  0x30   :  { %553 = vmatpush3.bf16.msra.mxu1 %v552_v16  ;;  %539 = vmatprep.subr.mxu0 %v665_v1  ;;  %v464_v12 = vld [vmem:[%s797_s3 + $0x5] ss:$0 sm:$0xff]  ;;  %v72_v18 = vld [vmem:[%s797_s3 + $0x7] sm:$0x1]  ;;  %p639_p6 = pnand %p638_p5, %p632_p2 }
  0x31   :  { %554 = vmatprep.subr.bf16.mxu1 %v663_v0  ;;  %537 = vmatmul.mubr.msk.f32.vlgmr.msra.gmra.mrb[2].mxu0 %vm284_vm5, %v45_v36 }
  0x32   :  { %541 = vmatprep.mubr.msk.f32.mxu0 %vm664_vm0, %v665_v1 }
  0x34   :  { %556 = vmatpush3.bf16.msra.mxu1 %v555_v19 }
  0x35   :  { %557 = vmatprep.subr.bf16.mxu1 %v663_v0 }
  0x38   :  { %559 = vmatpush3.bf16.msra.mxu1 %v558_v22 }
  0x39   :  { %560 = vmatprep.subr.bf16.mxu1 %v663_v0 }
  0x3c   :  { %562 = vmatpush3.bf16.msra.mxu1 %v561_v25 }
  0x3d   :  { %563 = vmatprep.subr.bf16.mxu1 %v663_v0 }
  0x40   :  { %565 = vmatpush3.bf16.msra.mxu1 %v564_v28 }
  0x41   :  { %566 = vmatprep.subr.bf16.mxu1 %v663_v0 }
  0x44   :  { %568 = vmatpush3.bf16.msra.mxu1 %v567_v31 }
  0x45   :  { %569 = vmatprep.subr.bf16.mxu1 %v663_v0 }
  0x48   :  { %571 = vmatpush3.bf16.msra.mxu1 %v570_v34 }
 0x100   :  { %v152_v7 = vpop.f32.mrb[0].mxu0 }
 0x101   :  { %v738_v8 = vadd.f32 %v457_v6, %v152_v7  ;;  %v498_v9 = vpop.f32.mrb[1].mxu0  ;;  %v465_v6 = vld [vmem:[%s797_s3 + $0x6] ss:$0 sm:$0xff] }
 0x103   :  { %156 = vadd.xlane.f32.xlu0 %v738_v8  ;;  %v160_v10 = vmul.f32 %v738_v8, %v738_v8 }
 0x104   :  { %v357_v58 = vpop.f32.mrb[2].mxu0 }
 0x105   :  { %v538_v59 = vpop.f32.mrb[3].mxu0 }
 0x107   :  { %161 = vadd.xlane.f32.xlu0 %v160_v10  ;;  %v463_v10 = vld [vmem:[%s797_s3 + $0x4] ss:$0 sm:$0xff] }
 0x11d   :  { %366 = vperm.xlu0 %582, %v73_v60  }
 0x190   :  { %v157_v37 = vpop.xlane.xlu0 %156 }
 0x191   :  { %v159_v38 = vmul.f32 0.0078125, %v157_v37 }
 0x193   :  { %v164_v40 = vmul.f32 %v159_v38, %v159_v38  ;;  %v167_v45 = vsub.f32 %v738_v8, %v159_v38  ;;  %v358_v8 = vadd.f32 %v465_v6, %v357_v58 }
 0x194   :  { %v162_v39 = vpop.xlane.xlu0 %161 }
 0x195   :  { %v163_v41 = vmul.f32 0.0078125, %v162_v39  ;;  %v361_v14 = vmax.f32 %v358_v8, 0.0 }
 0x197   :  { %v165_v42 = vsub.f32 %v163_v41, %v164_v40 }
 0x199   :  { %v166_v43 = vmax.f32 %v165_v42, 0.0 }
 0x19b   :  { %v168_v44 = vadd.f32 1e-05, %v166_v43 }
 0x19c   :  { %v367_v19 = vpop.permute.xlu0 %366 }
 0x19d   :  { %583 = vrsqrt.f32 %v168_v44 }
 0x1a7   :  { %v584_v46 = vpop.eup %583 }
 0x1a8   :  { %v170_v48 = vmul.f32 %v584_v46, %v167_v45 }
 0x1aa   :  { %v175_v50 = vmul.f32 %v460_v47, %v170_v48 }
 0x1ac   :  { %v180_v51 = vadd.f32 %v461_v49, %v175_v50 }
 0x1ae   :  { %v181_v52 = vmax.f32 %v180_v51, 0.0 }
 0x1b0   :  { %532 = vmatmul.mubr.f32.vlgmr.msra.gmra.mrb[0].mxu1 %v181_v52 }
 0x283   :  { %v252_v54 = vpop.f32.mrb[0].mxu1 }
 0x284   :  { %v253_v55 = vadd.f32 %v462_v53, %v252_v54  ;;  %v533_v56 = vpop.f32.mrb[1].mxu1 }
 0x286   :  { %256 = vadd.xlane.f32.xlu1 %v253_v55  ;;  %v259_v57 = vmul.f32 %v253_v55, %v253_v55 }
 0x28a   :  { %260 = vadd.xlane.f32.xlu1 %v259_v57 }
 0x313   :  { %v257_v62 = vpop.xlane.xlu1 %256 }
 0x314   :  { %v258_v63 = vmul.f32 0.015625, %v257_v62 }
 0x316   :  { %v263_v1 = vmul.f32 %v258_v63, %v258_v63  ;;  %v266_v7 = vsub.f32 %v253_v55, %v258_v63 }
 0x317   :  { %v261_v0 = vpop.xlane.xlu1 %260 }
 0x318   :  { %v262_v2 = vmul.f32 0.015625, %v261_v0 }
 0x31a   :  { %v264_v3 = vsub.f32 %v262_v2, %v263_v1 }
 0x31c   :  { %v265_v4 = vmax.f32 %v264_v3, 0.0 }
 0x31e   :  { %v267_v5 = vadd.f32 1e-05, %v265_v4 }
 0x320   :  { %585 = vrsqrt.f32 %v267_v5 }
 0x32a   :  { %v586_v9 = vpop.eup %585 }
 0x32b   :  { %v269_v11 = vmul.f32 %v586_v9, %v266_v7 }
 0x32d   :  { %v274_v13 = vmul.f32 %v463_v10, %v269_v11 }
 0x32f   :  { %v279_v15 = vadd.f32 %v464_v12, %v274_v13 }
 0x331   :  { %v362_v16 = vadd.f32 %v361_v14, %v279_v15 }
 0x333   :  { %v363_v17 = vmax.f32 %v362_v16, 0.0 }
 0x335   :  { %540 = vmatpush3.xpose.msra.mxu0 %v363_v17 }
 0x338   :  { %542 = vmatmul.mubr.f32.vlgmr.msra.gmra.mrb[4].mxu0 %v72_v18 }
 0x40b   :  { %v435_v20 = vpop.f32.mrb[4].mxu0 }
 0x40c   :  { %v436_v21 = vadd.f32 %v435_v20, %v367_v19  ;;  %v543_v22 = vpop.f32.mrb[5].mxu0 }
 0x40e   :  { %440 = vst.msk [vmem:[#allocation7] sm:$0x1] %vm439_vm6, %v436_v21 }
 0x40f   :  { %642 = shalt.err (!%p639_p6)
}
 0x410   :  { %s643_s0 = scalar_lea.hbm %s798_s4, 16 }
 0x411   :  { %p644_p7 = scmp.ne.s32.totalorder %s798_s4, %s643_s0  ;;  %p647_p8 = scmp.lt.u32.totalorder %s643_s0, %s798_s4 }
 0x413   :  { %p649_p9 = pnand %p647_p8, %p644_p7 }
 0x415   :  { %652 = shalt.err (!%p649_p9)
}
 0x416   :  { %450 = dma.vmem_to_hbm [thread:$0]  %s448_s7, 16, %s798_s4, [#allocation4]  }
 0x417   :  { %657 = dma.done.wait [#allocation4], 16  }
 0x418   :  { %658 = vsyncadd [#allocation4], 4294967280 }
 0x419   :  { %454 = vsyncpa [#allocation3], 1 }
 0x41a   :  { %455 = vsyncpa [#allocation6], 1 }
 0x41b   :  { %456 = vsyncpa [#allocation4], 1 }

</bundles_post_ra>
